<compile_context>
chip_gen: v7x
topology: tpu7x:2x2x1
jax: 0.10.0
libtpu: 0.0.40
codegen_flags: <defaults>
</compile_context>

<pallas_src>
import jax
import jax.numpy as jnp
from jax.experimental import pallas as pl
from jax.experimental.pallas import tpu as pltpu

HIDDEN1 = 400
HIDDEN2 = 300
LANE = 128
SUBLANE_BF16 = 16   # bf16 packs 16 rows per vreg
TRAIN_TILE = 256    # fills the 256-wide MXU on v6e/v7x


def _round_up(x, m):
    return ((x + m - 1) // m) * m


H1P = _round_up(HIDDEN1, LANE)   # 512
H2P = _round_up(HIDDEN2, LANE)   # 384


# ---------------------------------------------------------------------------
# Kernel bodies
# ---------------------------------------------------------------------------
def actor_kernel_overlap(x_ref, w1_ref, b1_ref, b2_ref, b3_ref, amax_ref,
                         w2_hbm, w3_hbm, o_ref, w2_buf, w3_buf, sem):
    """Single-tile path: manually DMA w2/w3 HBM->VMEM while fc1 runs."""
    cp_w2 = pltpu.make_async_copy(w2_hbm, w2_buf, sem.at[0])
    cp_w3 = pltpu.make_async_copy(w3_hbm, w3_buf, sem.at[1])
    cp_w2.start()
    cp_w3.start()

    # fc1 on the already-landed (tiny) w1 hides the w2/w3 transfer.
    h1 = jnp.dot(x_ref[...], w1_ref[...],
                 preferred_element_type=jnp.float32) + b1_ref[...]
    h1 = jnp.maximum(h1, 0.0)                                  # (TB, 512) f32

    cp_w2.wait()
    h2 = jnp.dot(h1.astype(jnp.bfloat16), w2_buf[...],
                 preferred_element_type=jnp.float32) + b2_ref[...]
    h2 = jnp.maximum(h2, 0.0)                                  # (TB, 384) f32

    cp_w3.wait()
    z = jnp.dot(h2.astype(jnp.bfloat16), w3_buf[...],
                preferred_element_type=jnp.float32) + b3_ref[...]
    o_ref[...] = (jnp.tanh(z) * amax_ref[...]).astype(o_ref.dtype)


def actor_kernel_pipelined(x_ref, w1_ref, b1_ref, w2_ref, b2_ref,
                           w3_ref, b3_ref, amax_ref, o_ref):
    """Batched path: auto-pipelined batch tiles; constant-index weight blocks
    are fetched once per core and stay VMEM-resident across the grid."""
    h1 = jnp.dot(x_ref[...], w1_ref[...],
                 preferred_element_type=jnp.float32) + b1_ref[...]
    h1 = jnp.maximum(h1, 0.0)
    h2 = jnp.dot(h1.astype(jnp.bfloat16), w2_ref[...],
                 preferred_element_type=jnp.float32) + b2_ref[...]
    h2 = jnp.maximum(h2, 0.0)
    z = jnp.dot(h2.astype(jnp.bfloat16), w3_ref[...],
                preferred_element_type=jnp.float32) + b3_ref[...]
    o_ref[...] = (jnp.tanh(z) * amax_ref[...]).astype(o_ref.dtype)


# ---------------------------------------------------------------------------
# Wrapper
# ---------------------------------------------------------------------------
def actor_forward(state, params, num_action_feats):
    """state: (B, num_state_feats) f32 -> actions (B, num_action_feats) f32."""
    w1, b1, w2, b2, w3, b3, amax = params
    B, S = state.shape
    AP = w3.shape[1]

    if B <= TRAIN_TILE:
        tile_b, nb = _round_up(max(B, 1), SUBLANE_BF16), 1
    else:
        tile_b = TRAIN_TILE
        nb = pl.cdiv(B, tile_b)
    b_pad = tile_b * nb

    x = state.astype(jnp.bfloat16)
    if b_pad != B:
        x = jnp.pad(x, ((0, b_pad - B), (0, 0)))

    flops = 2 * b_pad * (S * H1P + H1P * H2P + H2P * AP)
    transcendentals = b_pad * AP
    bytes_accessed = (b_pad * S + S * H1P + H1P * H2P + H2P * AP
                      + b_pad * AP) * 2 + (H1P + H2P + 2 * AP) * 4
    cost = pl.CostEstimate(flops=flops, transcendentals=transcendentals,
                           bytes_accessed=bytes_accessed)

    act_spec = lambda feat: pl.BlockSpec((tile_b, feat), lambda i: (i, 0))
    fixed = lambda shape: pl.BlockSpec(shape, lambda i: (0, 0))

    if nb == 1:
        # Inference / small-batch path: overlap w2/w3 DMA with fc1 compute.
        out = pl.pallas_call(
            actor_kernel_overlap,
            out_shape=jax.ShapeDtypeStruct((b_pad, AP), jnp.bfloat16),
            grid=(1,),
            in_specs=[
                act_spec(S),                         # x
                fixed((S, H1P)),                     # w1
                fixed((1, H1P)),                     # b1
                fixed((1, H2P)),                     # b2
                fixed((1, AP)),                      # b3
                fixed((1, AP)),                      # max_action (lane-padded)
                pl.BlockSpec(memory_space=pl.ANY),   # w2 stays in HBM
                pl.BlockSpec(memory_space=pl.ANY),   # w3 stays in HBM
            ],
            out_specs=act_spec(AP),
            scratch_shapes=[
                pltpu.VMEM((H1P, H2P), jnp.bfloat16),
                pltpu.VMEM((H2P, AP), jnp.bfloat16),
                pltpu.SemaphoreType.DMA((2,)),
            ],
            compiler_params=pltpu.CompilerParams(
                dimension_semantics=("arbitrary",)),
            cost_estimate=cost,
        )(x, w1, b1, b2, b3, amax, w2, w3)
    else:
        # Training path: 256-row tiles, batch axis parallel (megacore shards it
        # on v7x); weights fetched once per core by the auto pipeline.
        out = pl.pallas_call(
            actor_kernel_pipelined,
            out_shape=jax.ShapeDtypeStruct((b_pad, AP), jnp.bfloat16),
            grid=(nb,),
            in_specs=[
                act_spec(S),          # state tile
                fixed((S, H1P)),      # w1
                fixed((1, H1P)),      # b1
                fixed((H1P, H2P)),    # w2
                fixed((1, H2P)),      # b2
                fixed((H2P, AP)),     # w3
                fixed((1, AP)),       # b3
                fixed((1, AP)),       # max_action (lane-padded)
            ],
            out_specs=act_spec(AP),
            compiler_params=pltpu.CompilerParams(
                dimension_semantics=("parallel",)),
            cost_estimate=cost,
        )(x, w1, b1, w2, b2, w3, b3, amax)

    return out[:B, :num_action_feats].astype(jnp.float32)


def actor_reference(state, params, num_action_feats):
    """Pure-JAX reference of the same bf16-weight / bf16-activation math."""
    w1, b1, w2, b2, w3, b3, amax = params
    x = state.astype(jnp.bfloat16).astype(jnp.float32)
    h1 = jnp.maximum(x @ w1.astype(jnp.float32) + b1, 0.0)
    h1 = h1.astype(jnp.bfloat16).astype(jnp.float32)
    h2 = jnp.maximum(h1 @ w2.astype(jnp.float32) + b2, 0.0)
    h2 = h2.astype(jnp.bfloat16).astype(jnp.float32)
    z = h2 @ w3.astype(jnp.float32) + b3
    out = (jnp.tanh(z) * amax).astype(jnp.bfloat16).astype(jnp.float32)
    return out[:, :num_action_feats]


def init_params(key, num_state_feats, num_action_feats, max_action_values):
    """nn.Linear-style init (uniform +/- 1/sqrt(fan_in)), zero-padded to lane
    multiples and cast to bf16 for the kernel. Padding is zero so it does not
    change the math."""
    ap = _round_up(num_action_feats, LANE)

    def linear(k, fan_in, fan_out, pad_in, pad_out):
        kw, kb = jax.random.split(k)
        bound = 1.0 / jnp.sqrt(jnp.float32(fan_in))
        w = jax.random.uniform(kw, (fan_in, fan_out), jnp.float32, -bound, bound)
        b = jax.random.uniform(kb, (1, fan_out), jnp.float32, -bound, bound)
        wp = jnp.zeros((pad_in, pad_out), jnp.float32).at[:fan_in, :fan_out].set(w)
        bp = jnp.zeros((1, pad_out), jnp.float32).at[:, :fan_out].set(b)
        return wp.astype(jnp.bfloat16), bp

    k1, k2, k3 = jax.random.split(key, 3)
    w1, b1 = linear(k1, num_state_feats, HIDDEN1, num_state_feats, H1P)
    w2, b2 = linear(k2, HIDDEN1, HIDDEN2, H1P, H2P)
    w3, b3 = linear(k3, HIDDEN2, num_action_feats, H2P, ap)

    amax = jnp.zeros((1, ap), jnp.float32).at[0, :num_action_feats].set(
        jnp.asarray(max_action_values, jnp.float32)
        * jnp.ones((num_action_feats,), jnp.float32))
    return (w1, b1, w2, b2, w3, b3, amax)


if __name__ == "__main__":
    key = jax.random.PRNGKey(0)
    k_small, k_params, k_big = jax.random.split(key, 3)

    state_dim, action_dim = 24, 4          # small DDPG-style shapes
    max_action = 2.0
    params = init_params(k_params, state_dim, action_dim, max_action)

    # --- Inference / small-batch path (manual w2/w3 DMA overlap) ---
    B_small = 8
    state_small = jax.random.normal(k_small, (B_small, state_dim), jnp.float32)
    act_small = jax.block_until_ready(
        actor_forward(state_small, params, action_dim))
    ref_small = actor_reference(state_small, params, action_dim)

    # --- Batched training-size path (256-row tiles, parallel grid) ---
    B_big = 512
    state_big = jax.random.normal(k_big, (B_big, state_dim), jnp.float32)
    act_big = jax.block_until_ready(
        actor_forward(state_big, params, action_dim))
    ref_big = actor_reference(state_big, params, action_dim)

    assert act_small.shape == (B_small, action_dim)
    assert act_big.shape == (B_big, action_dim)
    assert jnp.all(jnp.abs(act_small) <= max_action + 1e-2)
    assert jnp.all(jnp.abs(act_big) <= max_action + 1e-2)
    assert jnp.allclose(act_small, ref_small, atol=1.5e-2, rtol=1.5e-2)
    assert jnp.allclose(act_big, ref_big, atol=1.5e-2, rtol=1.5e-2)

    print("KERNEL_OK")
</pallas_src>

<mosaic_0001>
module attributes {stable_mosaic.version = 11 : i64} {
  func.func @actor_kernel_overlap(%arg0: i32, %arg1: memref<16x24xbf16, #tpu.memory_space<vmem>>, %arg2: memref<24x512xbf16, #tpu.memory_space<vmem>>, %arg3: memref<1x512xf32, #tpu.memory_space<vmem>>, %arg4: memref<1x384xf32, #tpu.memory_space<vmem>>, %arg5: memref<1x128xf32, #tpu.memory_space<vmem>>, %arg6: memref<1x128xf32, #tpu.memory_space<vmem>>, %arg7: memref<512x384xbf16, #tpu.memory_space<any>>, %arg8: memref<384x128xbf16, #tpu.memory_space<any>>, %arg9: memref<16x128xbf16, #tpu.memory_space<vmem>>, %arg10: memref<512x384xbf16, #tpu.memory_space<vmem>>, %arg11: memref<384x128xbf16, #tpu.memory_space<vmem>>, %arg12: memref<2x!tpu.dma_semaphore, #tpu.memory_space<semaphore_mem>>) attributes {dimension_semantics = [#tpu.dimension_semantics<arbitrary>], iteration_bounds = array<i64: 1>, scalar_prefetch = 0 : i64, scratch_operands = 3 : i64, tpu.core_type = #tpu.core_type<tc>, window_params = [{transform_indices = @transform_0, window_bounds = array<i64: 16, 24>}, {pipeline_mode = #tpu.pipeline_mode<synchronous>, transform_indices = @transform_1, window_bounds = array<i64: 24, 512>}, {pipeline_mode = #tpu.pipeline_mode<synchronous>, transform_indices = @transform_2, window_bounds = array<i64: 1, 512>}, {pipeline_mode = #tpu.pipeline_mode<synchronous>, transform_indices = @transform_3, window_bounds = array<i64: 1, 384>}, {pipeline_mode = #tpu.pipeline_mode<synchronous>, transform_indices = @transform_4, window_bounds = array<i64: 1, 128>}, {pipeline_mode = #tpu.pipeline_mode<synchronous>, transform_indices = @transform_5, window_bounds = array<i64: 1, 128>}, {}, {}, {transform_indices = @transform_8, window_bounds = array<i64: 16, 128>}]} {
    %c0_i32 = arith.constant 0 : i32
    %0 = tpu.memref_slice %arg12[%c0_i32] : memref<2x!tpu.dma_semaphore, #tpu.memory_space<semaphore_mem>> -> memref<1x!tpu.dma_semaphore, #tpu.memory_space<semaphore_mem>>
    %1 = tpu.memref_squeeze %0 : memref<1x!tpu.dma_semaphore, #tpu.memory_space<semaphore_mem>> -> memref<!tpu.dma_semaphore, #tpu.memory_space<semaphore_mem>>
    tpu.enqueue_dma source(%arg7 : memref<512x384xbf16, #tpu.memory_space<any>>) target(%arg10 : memref<512x384xbf16, #tpu.memory_space<vmem>>) target_semaphore(%1 : memref<!tpu.dma_semaphore, #tpu.memory_space<semaphore_mem>>)
    %c1_i32 = arith.constant 1 : i32
    %2 = tpu.memref_slice %arg12[%c1_i32] : memref<2x!tpu.dma_semaphore, #tpu.memory_space<semaphore_mem>> -> memref<1x!tpu.dma_semaphore, #tpu.memory_space<semaphore_mem>>
    %3 = tpu.memref_squeeze %2 : memref<1x!tpu.dma_semaphore, #tpu.memory_space<semaphore_mem>> -> memref<!tpu.dma_semaphore, #tpu.memory_space<semaphore_mem>>
    tpu.enqueue_dma source(%arg8 : memref<384x128xbf16, #tpu.memory_space<any>>) target(%arg11 : memref<384x128xbf16, #tpu.memory_space<vmem>>) target_semaphore(%3 : memref<!tpu.dma_semaphore, #tpu.memory_space<semaphore_mem>>)
    %c0 = arith.constant 0 : index
    %c0_0 = arith.constant 0 : index
    %4 = vector.load %arg1[%c0, %c0_0] : memref<16x24xbf16, #tpu.memory_space<vmem>>, vector<16x24xbf16>
    %c0_1 = arith.constant 0 : index
    %c0_2 = arith.constant 0 : index
    %5 = vector.load %arg2[%c0_1, %c0_2] : memref<24x512xbf16, #tpu.memory_space<vmem>>, vector<24x512xbf16>
    %cst = arith.constant dense<0.000000e+00> : vector<16x512xf32>
    %6 = tpu.matmul %4, %5, %cst {dimension_numbers = #tpu.dot_dimension_numbers<[1], [0], [0], [1], [0, 0, 1, 1], [], []>} : vector<16x24xbf16>, vector<24x512xbf16>, vector<16x512xf32> -> vector<16x512xf32>
    %c0_3 = arith.constant 0 : index
    %c0_4 = arith.constant 0 : index
    %7 = vector.load %arg3[%c0_3, %c0_4] : memref<1x512xf32, #tpu.memory_space<vmem>>, vector<1x512xf32>
    %8 = vector.broadcast %7 : vector<1x512xf32> to vector<16x512xf32>
    %9 = arith.addf %6, %8 : vector<16x512xf32>
    %cst_5 = arith.constant 0.000000e+00 : f32
    %10 = vector.broadcast %cst_5 : f32 to vector<16x512xf32>
    %11 = arith.maximumf %9, %10 : vector<16x512xf32>
    %c0_i32_6 = arith.constant 0 : i32
    %12 = tpu.memref_slice %arg12[%c0_i32_6] : memref<2x!tpu.dma_semaphore, #tpu.memory_space<semaphore_mem>> -> memref<1x!tpu.dma_semaphore, #tpu.memory_space<semaphore_mem>>
    %13 = tpu.memref_squeeze %12 : memref<1x!tpu.dma_semaphore, #tpu.memory_space<semaphore_mem>> -> memref<!tpu.dma_semaphore, #tpu.memory_space<semaphore_mem>>
    tpu.wait_dma2 semaphore(%13 : memref<!tpu.dma_semaphore, #tpu.memory_space<semaphore_mem>>) src(%arg7 : memref<512x384xbf16, #tpu.memory_space<any>>) dst(%arg10 : memref<512x384xbf16, #tpu.memory_space<vmem>>)
    %14 = arith.truncf %11 : vector<16x512xf32> to vector<16x512xbf16>
    %c0_7 = arith.constant 0 : index
    %c0_8 = arith.constant 0 : index
    %15 = vector.load %arg10[%c0_7, %c0_8] : memref<512x384xbf16, #tpu.memory_space<vmem>>, vector<512x384xbf16>
    %cst_9 = arith.constant dense<0.000000e+00> : vector<16x384xf32>
    %16 = tpu.matmul %14, %15, %cst_9 {dimension_numbers = #tpu.dot_dimension_numbers<[1], [0], [0], [1], [0, 0, 1, 1], [], []>} : vector<16x512xbf16>, vector<512x384xbf16>, vector<16x384xf32> -> vector<16x384xf32>
    %c0_10 = arith.constant 0 : index
    %c0_11 = arith.constant 0 : index
    %17 = vector.load %arg4[%c0_10, %c0_11] : memref<1x384xf32, #tpu.memory_space<vmem>>, vector<1x384xf32>
    %18 = vector.broadcast %17 : vector<1x384xf32> to vector<16x384xf32>
    %19 = arith.addf %16, %18 : vector<16x384xf32>
    %cst_12 = arith.constant 0.000000e+00 : f32
    %20 = vector.broadcast %cst_12 : f32 to vector<16x384xf32>
    %21 = arith.maximumf %19, %20 : vector<16x384xf32>
    %c1_i32_13 = arith.constant 1 : i32
    %22 = tpu.memref_slice %arg12[%c1_i32_13] : memref<2x!tpu.dma_semaphore, #tpu.memory_space<semaphore_mem>> -> memref<1x!tpu.dma_semaphore, #tpu.memory_space<semaphore_mem>>
    %23 = tpu.memref_squeeze %22 : memref<1x!tpu.dma_semaphore, #tpu.memory_space<semaphore_mem>> -> memref<!tpu.dma_semaphore, #tpu.memory_space<semaphore_mem>>
    tpu.wait_dma2 semaphore(%23 : memref<!tpu.dma_semaphore, #tpu.memory_space<semaphore_mem>>) src(%arg8 : memref<384x128xbf16, #tpu.memory_space<any>>) dst(%arg11 : memref<384x128xbf16, #tpu.memory_space<vmem>>)
    %24 = arith.truncf %21 : vector<16x384xf32> to vector<16x384xbf16>
    %c0_14 = arith.constant 0 : index
    %c0_15 = arith.constant 0 : index
    %25 = vector.load %arg11[%c0_14, %c0_15] : memref<384x128xbf16, #tpu.memory_space<vmem>>, vector<384x128xbf16>
    %cst_16 = arith.constant dense<0.000000e+00> : vector<16x128xf32>
    %26 = tpu.matmul %24, %25, %cst_16 {dimension_numbers = #tpu.dot_dimension_numbers<[1], [0], [0], [1], [0, 0, 1, 1], [], []>} : vector<16x384xbf16>, vector<384x128xbf16>, vector<16x128xf32> -> vector<16x128xf32>
    %c0_17 = arith.constant 0 : index
    %c0_18 = arith.constant 0 : index
    %27 = vector.load %arg5[%c0_17, %c0_18] : memref<1x128xf32, #tpu.memory_space<vmem>>, vector<1x128xf32>
    %28 = vector.broadcast %27 : vector<1x128xf32> to vector<16x128xf32>
    %29 = arith.addf %26, %28 : vector<16x128xf32>
    %30 = math.tanh %29 : vector<16x128xf32>
    %c0_19 = arith.constant 0 : index
    %c0_20 = arith.constant 0 : index
    %31 = vector.load %arg6[%c0_19, %c0_20] : memref<1x128xf32, #tpu.memory_space<vmem>>, vector<1x128xf32>
    %32 = vector.broadcast %31 : vector<1x128xf32> to vector<16x128xf32>
    %33 = arith.mulf %30, %32 : vector<16x128xf32>
    %34 = arith.truncf %33 : vector<16x128xf32> to vector<16x128xbf16>
    %c0_21 = arith.constant 0 : index
    %c0_22 = arith.constant 0 : index
    %35 = vector.load %arg9[%c0_21, %c0_22] : memref<16x128xbf16, #tpu.memory_space<vmem>>, vector<16x128xbf16>
    tpu.vector_store %arg9[%c0_21, %c0_22], %34 {strides = array<i32>} : memref<16x128xbf16, #tpu.memory_space<vmem>>, vector<16x128xbf16>,
    return
  }
  func.func @transform_0(%arg0: i32) -> (i32, i32) {
    %c0_i32 = arith.constant 0 : i32
    %c0_i32_0 = arith.constant 0 : i32
    return %arg0, %c0_i32 : i32, i32
  }
  func.func @transform_1(%arg0: i32) -> (i32, i32) {
    %c0_i32 = arith.constant 0 : i32
    %c0_i32_0 = arith.constant 0 : i32
    %c0_i32_1 = arith.constant 0 : i32
    return %c0_i32, %c0_i32_0 : i32, i32
  }
  func.func @transform_2(%arg0: i32) -> (i32, i32) {
    %c0_i32 = arith.constant 0 : i32
    %c0_i32_0 = arith.constant 0 : i32
    %c0_i32_1 = arith.constant 0 : i32
    return %c0_i32, %c0_i32_0 : i32, i32
  }
  func.func @transform_3(%arg0: i32) -> (i32, i32) {
    %c0_i32 = arith.constant 0 : i32
    %c0_i32_0 = arith.constant 0 : i32
    %c0_i32_1 = arith.constant 0 : i32
    return %c0_i32, %c0_i32_0 : i32, i32
  }
  func.func @transform_4(%arg0: i32) -> (i32, i32) {
    %c0_i32 = arith.constant 0 : i32
    %c0_i32_0 = arith.constant 0 : i32
    %c0_i32_1 = arith.constant 0 : i32
    return %c0_i32, %c0_i32_0 : i32, i32
  }
  func.func @transform_5(%arg0: i32) -> (i32, i32) {
    %c0_i32 = arith.constant 0 : i32
    %c0_i32_0 = arith.constant 0 : i32
    %c0_i32_1 = arith.constant 0 : i32
    return %c0_i32, %c0_i32_0 : i32, i32
  }
  func.func @transform_8(%arg0: i32) -> (i32, i32) {
    %c0_i32 = arith.constant 0 : i32
    %c0_i32_0 = arith.constant 0 : i32
    return %arg0, %c0_i32 : i32, i32
  }
}

</mosaic_0001>

<bundles_post_ra>
// kernel: tpu_custom_call.1
= control target key start
LH: loop header
LB: loop body
LE: loop exit
PB: predicated region body
PF: predicated region fallthrough
CT: control target
= control target key end

     0   :  { %13 = vsyncpa [#allocation6], 0  ;;  %s1206_s0 = inlined_call_operand.hbm [shape: bf16[16,24], index: 0, kind: input, shape index: {}]   ;;  %s1207_s1 = inlined_call_operand.hbm [shape: bf16[24,512], index: 1, kind: input, shape index: {}]   ;;  %s1208_s2 = inlined_call_operand.vmem [shape: f32[1,512], index: 2, kind: input, shape index: {}]   ;;  %s1209_s3 = inlined_call_operand.vmem [shape: f32[1,384], index: 3, kind: input, shape index: {}]   ;;  %s1210_s4 = inlined_call_operand.vmem [shape: f32[1,128], index: 4, kind: input, shape index: {}]   ;;  %s1211_s5 = inlined_call_operand.vmem [shape: f32[1,128], index: 5, kind: input, shape index: {}]   ;;  %s1212_s6 = inlined_call_operand.hbm [shape: bf16[512,384], index: 6, kind: input, shape index: {}]   ;;  %s1213_s7 = inlined_call_operand.hbm [shape: bf16[384,128], index: 7, kind: input, shape index: {}]   ;;  %s1214_s8 = inlined_call_operand.hbm [shape: bf16[16,128], index: 8, kind: output, shape index: {}]  }
   0x1   :  { %14 = vsyncpa [#allocation9], 0 }
   0x2   :  { %15 = vsyncpa [#allocation7], 0  ;;  %s1008_s27 = smov [#allocation5]   ;;  %s910_s9 = scalar_lea.hbm %s1206_s0, 128 }
   0x3   :  { %s21_s28 = sshll.u32 %s1008_s27, 4  ;;  %p911_p0 = scmp.ne.s32.totalorder %s1206_s0, %s910_s9  ;;  %s22_s28 = int_to_ptr.vmem [resolvable:$true] %s21_s28 }
   0x4   :  { %p914_p1 = scmp.lt.u32.totalorder %s910_s9, %s1206_s0 }
   0x6   :  { %p916_p2 = pnand %p914_p1, %p911_p0 }
   0x8   :  { %919 = shalt.err (!%p916_p2)
}
   0x9   :  { %s920_s14 = scalar_lea.vmem %s22_s28, 128  ;;  %p925_p4 = scmp.lt.s32.totalorder %s22_s28, %s22_s28 }
   0xa   :  { %p921_p3 = scmp.ne.s32.totalorder %s22_s28, %s920_s14  ;;  %p926_p5 = scmp.lt.s32.totalorder %s920_s14, %s920_s14 }
   0xc   :  { %p927_p6 = por %p926_p5, %p925_p4 }
   0xe   :  { %p928_p7 = pnand %p927_p6, %p921_p3 }
  0x10   :  { %931 = shalt.err (!%p928_p7)
}
  0x11   :  { %s1009_s15 = smov 64   ;;  %s1010_s16 = smov 4  }
  0x12   :  { %27 = dma.hbm_to_vmem [thread:$0]  %s1206_s0, 128, %s22_s28, [#allocation6], %s1009_s15, %s1009_s15, %s1010_s16  }
  0x13   :  { %s1011_s19 = smov [#allocation8]   ;;  %s932_s23 = scalar_lea.hbm %s1207_s1, 768 }
  0x14   :  { %s33_s20 = sshll.u32 %s1011_s19, 4  ;;  %p933_p8 = scmp.ne.s32.totalorder %s1207_s1, %s932_s23  ;;  %s34_s20 = int_to_ptr.vmem [resolvable:$true] %s33_s20 }
  0x15   :  { %p936_p9 = scmp.lt.u32.totalorder %s932_s23, %s1207_s1 }
  0x17   :  { %p938_p10 = pnand %p936_p9, %p933_p8 }
  0x19   :  { %941 = shalt.err (!%p938_p10)
}
  0x1a   :  { %s942_s29 = scalar_lea.vmem %s34_s20, 768  ;;  %p947_p12 = scmp.lt.s32.totalorder %s34_s20, %s34_s20 }
  0x1b   :  { %p943_p11 = scmp.ne.s32.totalorder %s34_s20, %s942_s29  ;;  %p948_p13 = scmp.lt.s32.totalorder %s942_s29, %s942_s29 }
  0x1d   :  { %p949_p0 = por %p948_p13, %p947_p12 }
  0x1f   :  { %p950_p1 = pnand %p949_p0, %p943_p11 }
  0x21   :  { %953 = shalt.err (!%p950_p1)
}
  0x22   :  { %s1012_s0 = smov 256   ;;  %s1013_s28 = smov 16  }
  0x23   :  { %39 = dma.hbm_to_vmem [thread:$0]  %s1207_s1, 768, %s34_s20, [#allocation9], %s1012_s0, %s1012_s0, %s1013_s28  }
  0x24   :  { %998 = dma.done.wait [#allocation6], 128  }
  0x25   :  { %999 = vsyncadd [#allocation6], 4294967168 }
  0x26   :  { %1000 = dma.done.wait [#allocation9], 768  }
  0x27   :  { %1001 = vsyncadd [#allocation9], 4294966528  ;;  %s59_s10 = sld [smem:[#allocation0]]   ;;  %s1014_s11 = smov 384   ;;  %v1015_v0 = vmov 0   ;;  %vm171_vm0 = vcmask 1043456  }
  0x28   :  { %71 = sst [smem:[#allocation12]] %s1014_s11  ;;  %216 = vmatprep.mubr.bf16.mxu0 %v1015_v0  ;;  %259 = vmatprep.mubr.bf16.mxu1 %v1015_v0  ;;  %s1016_s12 = smov 3   ;;  %vm167_vm1 = vcmask 195584  }
  0x29   :  { %73 = sst [smem:[#allocation12 + $0x1]] %s1014_s11  ;;  %s1017_s13 = smov 128  }
  0x2a   :  { %75 = sst [smem:[#allocation12 + $0x2]] %s1016_s12  ;;  %s1018_s14 = smov 2  }
  0x2b   :  { %77 = sst [smem:[#allocation12 + $0x3]] %s1009_s15  ;;  %s1019_s1 = smov [#allocation2]  }
  0x2c   :  { %79 = sst [smem:[#allocation12 + $0x4]] %s1017_s13  ;;  %s67_s17 = sshll.u32 %s1019_s1, 4  ;;  %s68_s17 = int_to_ptr.vmem [resolvable:$true] %s67_s17 }
  0x2d   :  { %81 = sst [smem:[#allocation12 + $0x5]] %s1018_s14  ;;  %s745_s18 = sshll.u32 %s59_s10, 26 }
  0x2e   :  { %s1020_s19 = smov 192   ;;  %s746_s20 = sadd.s32 134217728, %s745_s18 }
  0x2f   :  { %83 = sst [smem:[#allocation12 + $0x6]] %s1020_s19  ;;  %s1021_s21 = smov [#allocation4]  }
  0x30   :  { %85 = sst [smem:[#allocation12 + $0x7]] %s1009_s15  ;;  %s1022_s22 = smov [#allocation11]  }
  0x31   :  { %87 = sst [smem:[#allocation12 + $0x8]] %s1010_s16  ;;  %s954_s29 = scalar_lea.hbm %s1213_s7, 3072 }
  0x32   :  { %89 = dma.general %s1212_s6, 12288, %s68_s17, %s1021_s21, %s1022_s22, [#allocation12], %s746_s20, 0  }
  0x33   :  { %v895_v1 = vld [vmem:[#allocation8 + $0x4] ss:$16 sps:$4 sm:$0xff]   ;;  %v897_v2 = vld [vmem:[#allocation8 + $0xc] ss:$16 sps:$4 sm:$0xff]   ;;  %v899_v3 = vld [vmem:[#allocation8] ss:$16 sps:$4 sm:$0xff]   ;;  %p955_p2 = scmp.ne.s32.totalorder %s1213_s7, %s954_s29  ;;  %p958_p3 = scmp.lt.u32.totalorder %s954_s29, %s1213_s7 }
  0x34   :  { %184 = vmatprep.subr.bf16.mxu0 %v895_v1  ;;  %v900_v4 = vld [vmem:[#allocation8 + $0x8] ss:$16 sps:$4 sm:$0xff]   ;;  %v108_v5 = vld [vmem:[#allocation8 + $0x20] sm:$0xff]  ;;  %227 = vmatprep.subr.bf16.mxu1 %v897_v2  ;;  %s1023_s6 = smov [#allocation3]  }
  0x35   :  { %v753_v6 = vcombine.high %v108_v5, %v108_v5  ;;  %v109_v7 = vld [vmem:[#allocation8 + $0x28] sm:$0xff]  ;;  %v752_v8 = vcombine.low %v108_v5, %v108_v5  ;;  %185 = vmatpush1.bf16.msra.mxu0 %v899_v3  ;;  %228 = vmatpush1.bf16.msra.mxu1 %v900_v4  ;;  %v905_v13 = vld [vmem:[#allocation5] sm:$0xff]   ;;  %s98_s25 = sshll.u32 %s1023_s6, 4  ;;  %p960_p4 = pnand %p958_p3, %p955_p2  ;;  %s99_s25 = int_to_ptr.vmem [resolvable:$true] %s98_s25 }
  0x36   :  { %v755_v9 = vcombine.high %v109_v7, %v109_v7  ;;  %v754_v10 = vcombine.low %v109_v7, %v109_v7 }
  0x37   :  { %756 = vmatprep.subr.msk.bf16.mxu0 %vm171_vm0, %v753_v6  ;;  %v173_v11 = vsel %vm171_vm0, %v752_v8, 0 }
  0x38   :  { %758 = vmatprep.subr.msk.bf16.mxu1 %vm171_vm0, %v755_v9  ;;  %v179_v12 = vsel %vm171_vm0, %v754_v10, 0 }
  0x39   :  { %187 = vmatpush1.bf16.msra.mxu0 %v173_v11  ;;  %230 = vmatpush1.bf16.msra.mxu1 %v179_v12 }
  0x3c   :  { %757 = vmatmul.mubr.msk.bf16.vlgmr.msra.gmra.mrb[0].mxu0 %vm167_vm1, %v905_v13  ;;  %759 = vmatmul.mubr.msk.bf16.vlgmr.msra.gmra.mrb[0].mxu1 %vm167_vm1, %v905_v13 }
  0x3d   :  { %963 = shalt.err (!%p960_p4)  }
  0x3e   :  { %s964_s10 = scalar_lea.vmem %s99_s25, 3072  ;;  %p969_p6 = scmp.lt.s32.totalorder %s99_s25, %s99_s25 }
  0x3f   :  { %p965_p5 = scmp.ne.s32.totalorder %s99_s25, %s964_s10  ;;  %p970_p7 = scmp.lt.s32.totalorder %s964_s10, %s964_s10 }
  0x41   :  { %p971_p8 = por %p970_p7, %p969_p6 }
  0x43   :  { %p972_p9 = pnand %p971_p8, %p965_p5 }
  0x45   :  { %975 = shalt.err (!%p972_p9)  }
  0x46   :  { %101 = dma.hbm_to_vmem [thread:$0]  %s1213_s7, 3072, %s99_s25, [#allocation4 + $0x1]  ;;  %v112_v14 = vlaneseq  ;;  %v110_v18 = vld [vmem:[%s1208_s2] sm:$0xf] }
  0x48   :  { %v1117_v15 = vshrl.u32 %v112_v14, 7 }
  0x4a   :  { %v114_v16 = vsub.s32 0, %v1117_v15  ;;  %v122_v17 = vsub.s32 2, %v1117_v15  ;;  %v118_v19 = vsub.s32 1, %v1117_v15  ;;  %v126_v20 = vsub.s32 3, %v1117_v15 }
  0x4c   :  { %v115_v21 = vrot.slane %v110_v18, %v114_v16  ;;  %v123_v22 = vrot.slane %v110_v18, %v122_v17  ;;  %v119_v23 = vrot.slane %v110_v18, %v118_v19  ;;  %v127_v24 = vrot.slane %v110_v18, %v126_v20 }
 0x10f   :  { %v218_v25 = vpop.f32.mrb[0].mxu0  ;;  %v261_v26 = vpop.f32.mrb[0].mxu1 }
 0x110   :  { %v1132_v27 = vadd.f32 %v218_v25, %v115_v21  ;;  %v1134_v28 = vadd.f32 %v261_v26, %v123_v22  ;;  %v220_v29 = vpop.f32.mrb[1].mxu0  ;;  %v263_v30 = vpop.f32.mrb[1].mxu1 }
 0x111   :  { %v221_v31 = vadd.f32 %v220_v29, %v119_v23  ;;  %v1136_v32 = vadd.f32 %v263_v30, %v127_v24  ;;  %v222_v33 = vpop.f32.mrb[2].mxu0  ;;  %v265_v34 = vpop.f32.mrb[2].mxu1 }
 0x112   :  { %v270_v35 = vmax.f32 %v1132_v27, 0.0  ;;  %v272_v36 = vmax.f32 %v1134_v28, 0.0  ;;  %v1140_v37 = vadd.f32 %v222_v33, %v115_v21  ;;  %v1142_v38 = vadd.f32 %v265_v34, %v123_v22  ;;  %v224_v39 = vpop.f32.mrb[3].mxu0  ;;  %v267_v40 = vpop.f32.mrb[3].mxu1 }
 0x113   :  { %v271_v41 = vmax.f32 %v221_v31, 0.0  ;;  %v273_v42 = vmax.f32 %v1136_v32, 0.0  ;;  %v225_v43 = vadd.f32 %v224_v39, %v119_v23  ;;  %v1145_v44 = vadd.f32 %v267_v40, %v127_v24 }
 0x114   :  { %v274_v45 = vmax.f32 %v1140_v37, 0.0  ;;  %v276_v46 = vmax.f32 %v1142_v38, 0.0 }
 0x115   :  { %v275_v47 = vmax.f32 %v225_v43, 0.0  ;;  %v277_v48 = vmax.f32 %v1145_v44, 0.0 }
 0x116   :  { %1002 = dma.done.wait [#allocation4], 12288 }
 0x117   :  { %1003 = vsyncadd [#allocation4], 4294955008  ;;  %v283_v49 = vpack.c.bf16 %v275_v47, %v271_v41  ;;  %v287_v50 = vld [vmem:[#allocation2 + $0x8] sm:$0xff]  ;;  %v286_v51 = vld [vmem:[#allocation2] sm:$0xff]  ;;  %v1154_v26 = vpack.c.bf16 %v274_v45, %v270_v35  ;;  %v285_v33 = vpack.c.bf16 %v277_v48, %v273_v42 }
 0x118   :  { %v290_v52 = vld [vmem:[#allocation2 + $0x20] sm:$0xff]  ;;  %399 = vmatprep.subr.bf16.mxu0 %v287_v50  ;;  %v289_v53 = vld [vmem:[#allocation2 + $0x18] sm:$0xff]  ;;  %v312_v55 = vld [vmem:[#allocation2 + $0xd0] sm:$0xff] }
 0x119   :  { %517 = vmatprep.mubr.bf16.mxu1 %v283_v49  ;;  %431 = vmatprep.mubr.bf16.mxu0 %v283_v49  ;;  %v293_v54 = vld [vmem:[#allocation2 + $0x38] sm:$0xff]  ;;  %v288_v56 = vld [vmem:[#allocation2 + $0x10] sm:$0xff]  ;;  %v315_v57 = vld [vmem:[#allocation2 + $0xe8] sm:$0xff] }
 0x11a   :  { %400 = vmatpush1.bf16.msra.mxu0 %v286_v51  ;;  %773 = vmatprep.subr.bf16.mxu1 %v312_v55  ;;  %v292_v58 = vld [vmem:[#allocation2 + $0x30] sm:$0xff]  ;;  %v291_v60 = vld [vmem:[#allocation2 + $0x28] sm:$0xff]  ;;  %v318_v61 = vld [vmem:[#allocation2 + $0x100] sm:$0xff] }
 0x11b   :  { %401 = vmatprep.subr.bf16.mxu0 %v290_v52  ;;  %774 = vmatpush3.bf16.msra.mxu1 %v288_v56  ;;  %v296_v59 = vld [vmem:[#allocation2 + $0x50] sm:$0xff]  ;;  %v295_v62 = vld [vmem:[#allocation2 + $0x48] sm:$0xff]  ;;  %v294_v0 = vld [vmem:[#allocation2 + $0x40] sm:$0xff] }
 0x11c   :  { %775 = vmatprep.subr.bf16.mxu1 %v315_v57  ;;  %v299_v63 = vld [vmem:[#allocation2 + $0x68] sm:$0xff]  ;;  %v321_v1 = vld [vmem:[#allocation2 + $0x118] sm:$0xff]  ;;  %v298_v2 = vld [vmem:[#allocation2 + $0x60] sm:$0xff] }
 0x11d   :  { %v302_v3 = vld [vmem:[#allocation2 + $0x80] sm:$0xff]  ;;  %v297_v4 = vld [vmem:[#allocation2 + $0x58] sm:$0xff]  ;;  %v324_v5 = vld [vmem:[#allocation2 + $0x130] sm:$0xff] }
 0x11e   :  { %402 = vmatpush1.bf16.msra.mxu0 %v289_v53  ;;  %v301_v6 = vld [vmem:[#allocation2 + $0x78] sm:$0xff]  ;;  %v300_v8 = vld [vmem:[#allocation2 + $0x70] sm:$0xff]  ;;  %v327_v9 = vld [vmem:[#allocation2 + $0x148] sm:$0xff] }
 0x11f   :  { %403 = vmatprep.subr.bf16.mxu0 %v293_v54  ;;  %776 = vmatpush3.bf16.msra.mxu1 %v291_v60  ;;  %v305_v7 = vld [vmem:[#allocation2 + $0x98] sm:$0xff]  ;;  %v304_v10 = vld [vmem:[#allocation2 + $0x90] sm:$0xff]  ;;  %v303_v12 = vld [vmem:[#allocation2 + $0x88] sm:$0xff] }
 0x120   :  { %777 = vmatprep.subr.bf16.mxu1 %v318_v61  ;;  %v308_v11 = vld [vmem:[#allocation2 + $0xb0] sm:$0xff]  ;;  %v330_v13 = vld [vmem:[#allocation2 + $0x160] sm:$0xff]  ;;  %v307_v14 = vld [vmem:[#allocation2 + $0xa8] sm:$0xff] }
 0x121   :  { %v311_v18 = vld [vmem:[#allocation2 + $0xc8] sm:$0xff]  ;;  %v306_v20 = vld [vmem:[#allocation2 + $0xa0] sm:$0xff]  ;;  %v333_v21 = vld [vmem:[#allocation2 + $0x178] sm:$0xff] }
 0x122   :  { %404 = vmatpush1.bf16.msra.mxu0 %v292_v58  ;;  %v310_v22 = vld [vmem:[#allocation2 + $0xc0] sm:$0xff]  ;;  %v309_v24 = vld [vmem:[#allocation2 + $0xb8] sm:$0xff]  ;;  %v360_v25 = vld [vmem:[#allocation2 + $0x250] sm:$0xff] }
 0x123   :  { %405 = vmatprep.subr.bf16.mxu0 %v296_v59  ;;  %778 = vmatpush3.bf16.msra.mxu1 %v294_v0  ;;  %v314_v23 = vld [vmem:[#allocation2 + $0xe0] sm:$0xff]  ;;  %v313_v29 = vld [vmem:[#allocation2 + $0xd8] sm:$0xff]  ;;  %v336_v31 = vld [vmem:[#allocation2 + $0x190] sm:$0xff] }
 0x124   :  { %779 = vmatprep.subr.bf16.mxu1 %v321_v1  ;;  %v317_v30 = vld [vmem:[#allocation2 + $0xf8] sm:$0xff]  ;;  %v363_v34 = vld [vmem:[#allocation2 + $0x268] sm:$0xff]  ;;  %v316_v27 = vld [vmem:[#allocation2 + $0xf0] sm:$0xff] }
 0x125   :  { %v320_v35 = vld [vmem:[#allocation2 + $0x110] sm:$0xff]  ;;  %v339_v37 = vld [vmem:[#allocation2 + $0x1a8] sm:$0xff]  ;;  %v366_v39 = vld [vmem:[#allocation2 + $0x280] sm:$0xff] }
 0x126   :  { %406 = vmatpush1.bf16.msra.mxu0 %v295_v62  ;;  %v319_v40 = vld [vmem:[#allocation2 + $0x108] sm:$0xff]  ;;  %v342_v41 = vld [vmem:[#allocation2 + $0x1c0] sm:$0xff]  ;;  %v369_v42 = vld [vmem:[#allocation2 + $0x298] sm:$0xff] }
 0x127   :  { %407 = vmatprep.subr.bf16.mxu0 %v299_v63  ;;  %780 = vmatpush3.bf16.msra.mxu1 %v297_v4  ;;  %v323_v32 = vld [vmem:[#allocation2 + $0x128] sm:$0xff]  ;;  %v322_v43 = vld [vmem:[#allocation2 + $0x120] sm:$0xff]  ;;  %v345_v45 = vld [vmem:[#allocation2 + $0x1d8] sm:$0xff]  ;;  %v284_v63 = vpack.c.bf16 %v276_v46, %v272_v36 }
 0x128   :  { %781 = vmatprep.subr.bf16.mxu1 %v324_v5  ;;  %v326_v44 = vld [vmem:[#allocation2 + $0x140] sm:$0xff]  ;;  %v372_v47 = vld [vmem:[#allocation2 + $0x2b0] sm:$0xff]  ;;  %v325_v48 = vld [vmem:[#allocation2 + $0x138] sm:$0xff] }
 0x129   :  { %v329_v49 = vld [vmem:[#allocation2 + $0x158] sm:$0xff]  ;;  %v348_v50 = vld [vmem:[#allocation2 + $0x1f0] sm:$0xff]  ;;  %v375_v51 = vld [vmem:[#allocation2 + $0x2c8] sm:$0xff] }
 0x12a   :  { %408 = vmatpush1.bf16.msra.mxu0 %v298_v2  ;;  %v328_v52 = vld [vmem:[#allocation2 + $0x150] sm:$0xff]  ;;  %v351_v54 = vld [vmem:[#allocation2 + $0x208] sm:$0xff]  ;;  %v378_v55 = vld [vmem:[#allocation2 + $0x2e0] sm:$0xff] }
 0x12b   :  { %409 = vmatprep.subr.bf16.mxu0 %v302_v3  ;;  %782 = vmatpush3.bf16.msra.mxu1 %v300_v8  ;;  %v332_v53 = vld [vmem:[#allocation2 + $0x170] sm:$0xff]  ;;  %v331_v56 = vld [vmem:[#allocation2 + $0x168] sm:$0xff]  ;;  %v354_v58 = vld [vmem:[#allocation2 + $0x220] sm:$0xff] }
 0x12c   :  { %783 = vmatprep.subr.bf16.mxu1 %v327_v9  ;;  %v335_v57 = vld [vmem:[#allocation2 + $0x188] sm:$0xff]  ;;  %v381_v59 = vld [vmem:[#allocation2 + $0x2f8] sm:$0xff]  ;;  %v334_v60 = vld [vmem:[#allocation2 + $0x180] sm:$0xff] }
 0x12d   :  { %v338_v61 = vld [vmem:[#allocation2 + $0x1a0] sm:$0xff]  ;;  %v357_v62 = vld [vmem:[#allocation2 + $0x238] sm:$0xff]  ;;  %v340_v2 = vld [vmem:[#allocation2 + $0x1b0] sm:$0xff] }
 0x12e   :  { %410 = vmatpush1.bf16.msra.mxu0 %v301_v6  ;;  %v337_v0 = vld [vmem:[#allocation2 + $0x198] sm:$0xff]  ;;  %v344_v3 = vld [vmem:[#allocation2 + $0x1d0] sm:$0xff]  ;;  %v343_v4 = vld [vmem:[#allocation2 + $0x1c8] sm:$0xff] }
 0x12f   :  { %411 = vmatprep.subr.bf16.mxu0 %v305_v7  ;;  %784 = vmatpush3.bf16.msra.mxu1 %v303_v12  ;;  %v341_v1 = vld [vmem:[#allocation2 + $0x1b8] sm:$0xff]  ;;  %v347_v5 = vld [vmem:[#allocation2 + $0x1e8] sm:$0xff]  ;;  %v346_v28 = vld [vmem:[#allocation2 + $0x1e0] sm:$0xff] }
 0x130   :  { %785 = vmatprep.subr.bf16.mxu1 %v330_v13  ;;  %v350_v6 = vld [vmem:[#allocation2 + $0x200] sm:$0xff]  ;;  %v349_v36 = vld [vmem:[#allocation2 + $0x1f8] sm:$0xff]  ;;  %v352_v46 = vld [vmem:[#allocation2 + $0x210] sm:$0xff] }
 0x131   :  { %v353_v38 = vld [vmem:[#allocation2 + $0x218] sm:$0xff]  ;;  %v356_v7 = vld [vmem:[#allocation2 + $0x230] sm:$0xff]  ;;  %v355_v8 = vld [vmem:[#allocation2 + $0x228] sm:$0xff] }
 0x132   :  { %412 = vmatpush1.bf16.msra.mxu0 %v304_v10  ;;  %v359_v9 = vld [vmem:[#allocation2 + $0x248] sm:$0xff]  ;;  %v358_v10 = vld [vmem:[#allocation2 + $0x240] sm:$0xff]  ;;  %v361_v12 = vld [vmem:[#allocation2 + $0x258] sm:$0xff] }
 0x133   :  { %413 = vmatprep.subr.bf16.mxu0 %v308_v11  ;;  %786 = vmatpush3.bf16.msra.mxu1 %v306_v20  ;;  %v362_v11 = vld [vmem:[#allocation2 + $0x260] sm:$0xff]  ;;  %v365_v13 = vld [vmem:[#allocation2 + $0x278] sm:$0xff]  ;;  %v367_v20 = vld [vmem:[#allocation2 + $0x288] sm:$0xff] }
 0x134   :  { %787 = vmatprep.subr.bf16.mxu1 %v333_v21  ;;  %v371_v21 = vld [vmem:[#allocation2 + $0x2a8] sm:$0xff] }
 0x136   :  { %414 = vmatpush1.bf16.msra.mxu0 %v307_v14  ;;  %v364_v14 = vld [vmem:[#allocation2 + $0x270] sm:$0xff] }
 0x137   :  { %415 = vmatprep.subr.bf16.mxu0 %v311_v18  ;;  %788 = vmatpush3.bf16.msra.mxu1 %v309_v24  ;;  %v368_v18 = vld [vmem:[#allocation2 + $0x290] sm:$0xff]  ;;  %v373_v24 = vld [vmem:[#allocation2 + $0x2b8] sm:$0xff] }
 0x138   :  { %795 = vmatprep.subr.bf16.mxu1 %v360_v25  ;;  %v377_v25 = vld [vmem:[#allocation2 + $0x2d8] sm:$0xff] }
 0x13a   :  { %416 = vmatpush1.bf16.msra.mxu0 %v310_v22  ;;  %518 = vmatmul.mubr.bf16.vlgmr.msra.gmra.mrb[4].mxu1 %v1154_v26  ;;  %v370_v22 = vld [vmem:[#allocation2 + $0x2a0] sm:$0xff] }
 0x13b   :  { %417 = vmatprep.subr.bf16.mxu0 %v314_v23  ;;  %796 = vmatpush3.bf16.msra.mxu1 %v336_v31  ;;  %v374_v23 = vld [vmem:[#allocation2 + $0x2c0] sm:$0xff] }
 0x13c   :  { %797 = vmatprep.subr.bf16.mxu1 %v363_v34  ;;  %558 = vmatprep.mubr.bf16.mxu1 %v285_v33 }
 0x13e   :  { %418 = vmatpush1.bf16.msra.mxu0 %v313_v29  ;;  %v380_v29 = vld [vmem:[#allocation2 + $0x2f0] sm:$0xff] }
 0x13f   :  { %419 = vmatprep.subr.bf16.mxu0 %v317_v30  ;;  %798 = vmatpush3.bf16.msra.mxu1 %v339_v37  ;;  %v379_v30 = vld [vmem:[#allocation2 + $0x2e8] sm:$0xff] }
 0x140   :  { %799 = vmatprep.subr.bf16.mxu1 %v366_v39  ;;  %v382_v39 = vld [vmem:[%s1209_s3] sm:$0x7] }
 0x142   :  { %420 = vmatpush1.bf16.msra.mxu0 %v316_v27 }
 0x143   :  { %421 = vmatprep.subr.bf16.mxu0 %v320_v35  ;;  %800 = vmatpush3.bf16.msra.mxu1 %v342_v41 }
 0x144   :  { %801 = vmatprep.subr.bf16.mxu1 %v369_v42 }
 0x146   :  { %422 = vmatpush1.bf16.msra.mxu0 %v319_v40  ;;  %v395_v40 = vrot.slane %v382_v39, %v122_v17  ;;  %v391_v17 = vrot.slane %v382_v39, %v118_v19 }
 0x147   :  { %423 = vmatprep.subr.bf16.mxu0 %v323_v32  ;;  %802 = vmatpush3.bf16.msra.mxu1 %v345_v45 }
 0x148   :  { %803 = vmatprep.subr.bf16.mxu1 %v372_v47 }
 0x14a   :  { %424 = vmatpush1.bf16.msra.mxu0 %v322_v43 }
 0x14b   :  { %425 = vmatprep.subr.bf16.mxu0 %v326_v44  ;;  %804 = vmatpush3.bf16.msra.mxu1 %v348_v50 }
 0x14c   :  { %805 = vmatprep.subr.bf16.mxu1 %v375_v51 }
 0x14e   :  { %426 = vmatpush1.bf16.msra.mxu0 %v325_v48 }
 0x14f   :  { %427 = vmatprep.subr.bf16.mxu0 %v329_v49  ;;  %806 = vmatpush3.bf16.msra.mxu1 %v351_v54 }
 0x150   :  { %807 = vmatprep.subr.bf16.mxu1 %v378_v55 }
 0x152   :  { %428 = vmatpush1.bf16.msra.mxu0 %v328_v52 }
 0x153   :  { %429 = vmatprep.subr.bf16.mxu0 %v332_v53  ;;  %808 = vmatpush3.bf16.msra.mxu1 %v354_v58  ;;  %v387_v53 = vrot.slane %v382_v39, %v114_v16 }
 0x154   :  { %809 = vmatprep.subr.bf16.mxu1 %v381_v59 }
 0x156   :  { %430 = vmatpush1.bf16.msra.mxu0 %v331_v56 }
 0x157   :  { %442 = vmatprep.subr.bf16.mxu0 %v335_v57  ;;  %810 = vmatpush3.bf16.msra.mxu1 %v357_v62 }
 0x159   :  { %432 = vmatmul.mubr.bf16.vlgmr.msra.gmra.mrb[4].mxu0 %v1154_v26  ;;  %v376_v26 = vld [vmem:[#allocation2 + $0x2d0] sm:$0xff] }
 0x15a   :  { %443 = vmatpush1.bf16.msra.mxu0 %v334_v60  ;;  %474 = vmatprep.mubr.bf16.mxu0 %v285_v33 }
 0x15b   :  { %444 = vmatprep.subr.bf16.mxu0 %v338_v61  ;;  %559 = vmatmul.mubr.bf16.vlgmr.msra.gmra.mrb[8].mxu1 %v284_v63 }
 0x15e   :  { %445 = vmatpush1.bf16.msra.mxu0 %v337_v0 }
 0x15f   :  { %446 = vmatprep.subr.bf16.mxu0 %v341_v1 }
 0x162   :  { %447 = vmatpush1.bf16.msra.mxu0 %v340_v2 }
 0x163   :  { %448 = vmatprep.subr.bf16.mxu0 %v344_v3 }
 0x166   :  { %449 = vmatpush1.bf16.msra.mxu0 %v343_v4 }
 0x167   :  { %450 = vmatprep.subr.bf16.mxu0 %v347_v5 }
 0x16a   :  { %451 = vmatpush1.bf16.msra.mxu0 %v346_v28 }
 0x16b   :  { %452 = vmatprep.subr.bf16.mxu0 %v350_v6 }
 0x16e   :  { %453 = vmatpush1.bf16.msra.mxu0 %v349_v36 }
 0x16f   :  { %454 = vmatprep.subr.bf16.mxu0 %v353_v38 }
 0x172   :  { %455 = vmatpush1.bf16.msra.mxu0 %v352_v46 }
 0x173   :  { %456 = vmatprep.subr.bf16.mxu0 %v356_v7 }
 0x176   :  { %457 = vmatpush1.bf16.msra.mxu0 %v355_v8 }
 0x177   :  { %458 = vmatprep.subr.bf16.mxu0 %v359_v9 }
 0x17a   :  { %459 = vmatpush1.bf16.msra.mxu0 %v358_v10 }
 0x17b   :  { %460 = vmatprep.subr.bf16.mxu0 %v362_v11 }
 0x17e   :  { %461 = vmatpush1.bf16.msra.mxu0 %v361_v12 }
 0x17f   :  { %462 = vmatprep.subr.bf16.mxu0 %v365_v13 }
 0x182   :  { %463 = vmatpush1.bf16.msra.mxu0 %v364_v14 }
 0x183   :  { %464 = vmatprep.subr.bf16.mxu0 %v368_v18 }
 0x186   :  { %465 = vmatpush1.bf16.msra.mxu0 %v367_v20 }
 0x187   :  { %466 = vmatprep.subr.bf16.mxu0 %v371_v21 }
 0x18a   :  { %467 = vmatpush1.bf16.msra.mxu0 %v370_v22 }
 0x18b   :  { %468 = vmatprep.subr.bf16.mxu0 %v374_v23 }
 0x18e   :  { %469 = vmatpush1.bf16.msra.mxu0 %v373_v24 }
 0x18f   :  { %470 = vmatprep.subr.bf16.mxu0 %v377_v25 }
 0x192   :  { %471 = vmatpush1.bf16.msra.mxu0 %v376_v26 }
 0x193   :  { %472 = vmatprep.subr.bf16.mxu0 %v380_v29 }
 0x196   :  { %473 = vmatpush1.bf16.msra.mxu0 %v379_v30 }
 0x199   :  { %475 = vmatmul.mubr.bf16.vlgmr.msra.gmra.mrb[4].mxu0 %v284_v63 }
 0x20d   :  { %v789_v31 = vpop.f32.mrb[4].mxu1 }
 0x20e   :  { %v790_v33 = vpop.f32.mrb[5].mxu1 }
 0x20f   :  { %v791_v34 = vadd.f32 %v790_v33, %v789_v31  ;;  %v792_v27 = vpop.f32.mrb[6].mxu1 }
 0x210   :  { %v793_v35 = vpop.f32.mrb[7].mxu1 }
 0x211   :  { %v794_v37 = vadd.f32 %v793_v35, %v792_v27  ;;  %v520_v32 = vadd.f32 %v791_v34, %v395_v40 }
 0x213   :  { %v523_v43 = vadd.f32 %v794_v37, %v395_v40 }
 0x22e   :  { %v811_v41 = vpop.f32.mrb[8].mxu1 }
 0x22f   :  { %v812_v42 = vpop.f32.mrb[9].mxu1 }
 0x230   :  { %v813_v44 = vadd.f32 %v812_v42, %v811_v41  ;;  %v814_v45 = vpop.f32.mrb[10].mxu1 }
 0x231   :  { %v815_v47 = vpop.f32.mrb[11].mxu1 }
 0x232   :  { %v1171_v48 = vadd.f32 %v813_v44, %v520_v32  ;;  %v816_v49 = vadd.f32 %v815_v47, %v814_v45 }
 0x234   :  { %v569_v50 = vmax.f32 %v1171_v48, 0.0  ;;  %v1174_v51 = vadd.f32 %v816_v49, %v523_v43 }
 0x236   :  { %v572_v52 = vmax.f32 %v1174_v51, 0.0 }
 0x26c   :  { %v476_v54 = vpop.f32.mrb[4].mxu0 }
 0x26d   :  { %v868_v55 = vadd.f32 %v476_v54, %v387_v53  ;;  %v478_v56 = vpop.f32.mrb[5].mxu0 }
 0x26e   :  { %v869_v57 = vadd.f32 %v478_v56, %v391_v17  ;;  %v480_v58 = vpop.f32.mrb[6].mxu0 }
 0x26f   :  { %v567_v59 = vmax.f32 %v868_v55, 0.0  ;;  %v870_v60 = vadd.f32 %v480_v58, %v387_v53  ;;  %v482_v61 = vpop.f32.mrb[7].mxu0 }
 0x270   :  { %v568_v62 = vmax.f32 %v869_v57, 0.0  ;;  %v871_v63 = vadd.f32 %v482_v61, %v391_v17 }
 0x271   :  { %v570_v0 = vmax.f32 %v870_v60, 0.0 }
 0x272   :  { %v571_v1 = vmax.f32 %v871_v63, 0.0 }
 0x273   :  { %1004 = dma.done.wait [#allocation4 + $0x1], 3072 }
 0x274   :  { %1005 = vsyncadd [#allocation4 + $0x1], 4294964224  ;;  %v578_v2 = vpack.c.bf16 %v571_v1, %v568_v62  ;;  %v588_v16 = vld [vmem:[#allocation3 + $0x40] sm:$0xff]  ;;  %v589_v15 = vld [vmem:[#allocation3 + $0x48] sm:$0xff]  ;;  %v577_v12 = vpack.c.bf16 %v570_v0, %v567_v59  ;;  %v1024_v13 = vmov 0.0   ;;  %vm1025_vm2 = vmmov 0  }
 0x275   :  { %v580_v3 = vld [vmem:[#allocation3] sm:$0xff]  ;;  %817 = vmatprep.subr.bf16.mxu1 %v588_v16  ;;  %v581_v19 = vld [vmem:[#allocation3 + $0x8] sm:$0xff]  ;;  %v590_v4 = vld [vmem:[#allocation3 + $0x50] sm:$0xff]  ;;  %v579_v26 = vpack.c.bf16 %v572_v52, %v569_v50  ;;  %s1026_s19 = smov [#allocation10]  }
 0x276   :  { %643 = vmatprep.mubr.bf16.mxu1 %v578_v2  ;;  %818 = vmatpush3.bf16.msra.mxu1 %v580_v3  ;;  %v582_v5 = vld [vmem:[#allocation3 + $0x10] sm:$0xff]  ;;  %v591_v28 = vld [vmem:[#allocation3 + $0x58] sm:$0xff]  ;;  %v592_v36 = vld [vmem:[#allocation3 + $0x60] sm:$0xff]  ;;  %s719_s20 = sshll.u32 %s1026_s19, 4  ;;  %s720_s20 = int_to_ptr.vmem [resolvable:$true] %s719_s20 }
 0x277   :  { %819 = vmatprep.subr.bf16.mxu1 %v589_v15  ;;  %v583_v6 = vld [vmem:[#allocation3 + $0x18] sm:$0xff]  ;;  %v584_v38 = vld [vmem:[#allocation3 + $0x20] sm:$0xff]  ;;  %v593_v46 = vld [vmem:[#allocation3 + $0x68] sm:$0xff]  ;;  %p981_p11 = scmp.lt.s32.totalorder %s720_s20, %s720_s20 }
 0x278   :  { %v585_v7 = vld [vmem:[#allocation3 + $0x28] sm:$0xff]  ;;  %v594_v8 = vld [vmem:[#allocation3 + $0x70] sm:$0xff]  ;;  %v595_v10 = vld [vmem:[#allocation3 + $0x78] sm:$0xff] }
 0x279   :  { %v586_v9 = vld [vmem:[#allocation3 + $0x30] sm:$0xff]  ;;  %v587_v11 = vld [vmem:[#allocation3 + $0x38] sm:$0xff]  ;;  %v596_v14 = vld [vmem:[#allocation3 + $0x80] sm:$0xff] }
 0x27a   :  { %820 = vmatpush3.bf16.msra.mxu1 %v581_v19  ;;  %v597_v18 = vld [vmem:[#allocation3 + $0x88] sm:$0xff]  ;;  %v598_v20 = vld [vmem:[#allocation3 + $0x90] sm:$0xff]  ;;  %v599_v21 = vld [vmem:[#allocation3 + $0x98] sm:$0xff] }
 0x27b   :  { %821 = vmatprep.subr.bf16.mxu1 %v590_v4  ;;  %v600_v22 = vld [vmem:[#allocation3 + $0xa0] sm:$0xff]  ;;  %v601_v23 = vld [vmem:[#allocation3 + $0xa8] sm:$0xff]  ;;  %v602_v24 = vld [vmem:[#allocation3 + $0xb0] sm:$0xff] }
 0x27c   :  { %v603_v25 = vld [vmem:[#allocation3 + $0xb8] sm:$0xff]  ;;  %v760_v35 = vld [vmem:[%s1210_s4] ss:$0 sm:$0xff]  ;;  %s976_s4 = scalar_lea.vmem %s720_s20, 128 }
 0x27d   :  { %v761_v47 = vld [vmem:[%s1211_s5] ss:$0 sm:$0xff]  ;;  %p977_p10 = scmp.ne.s32.totalorder %s720_s20, %s976_s4  ;;  %p982_p12 = scmp.lt.s32.totalorder %s976_s4, %s976_s4 }
 0x27e   :  { %822 = vmatpush3.bf16.msra.mxu1 %v582_v5 }
 0x27f   :  { %823 = vmatprep.subr.bf16.mxu1 %v591_v28  ;;  %p983_p13 = por %p982_p12, %p981_p11 }
 0x281   :  { %p984_p0 = pnand %p983_p13, %p977_p10 }
 0x282   :  { %824 = vmatpush3.bf16.msra.mxu1 %v583_v6 }
 0x283   :  { %825 = vmatprep.subr.bf16.mxu1 %v592_v36 }
 0x286   :  { %826 = vmatpush3.bf16.msra.mxu1 %v584_v38 }
 0x287   :  { %827 = vmatprep.subr.bf16.mxu1 %v593_v46 }
 0x28a   :  { %828 = vmatpush3.bf16.msra.mxu1 %v585_v7 }
 0x28b   :  { %829 = vmatprep.subr.bf16.mxu1 %v594_v8 }
 0x28e   :  { %830 = vmatpush3.bf16.msra.mxu1 %v586_v9 }
 0x28f   :  { %831 = vmatprep.subr.bf16.mxu1 %v595_v10 }
 0x292   :  { %832 = vmatpush3.bf16.msra.mxu1 %v587_v11 }
 0x293   :  { %848 = vmatprep.subr.bf16.mxu1 %v1024_v13 }
 0x295   :  { %644 = vmatmul.mubr.bf16.vlgmr.msra.gmra.mrb[12].mxu1 %v577_v12 }
 0x296   :  { %849 = vmatpush3.bf16.msra.mxu1 %v596_v14  ;;  %864 = vmatprep.mubr.msk.bf16.mxu1 %vm1025_vm2, %v1024_v13 }
 0x297   :  { %850 = vmatprep.subr.bf16.mxu1 %v1024_v13 }
 0x29a   :  { %851 = vmatpush3.bf16.msra.mxu1 %v597_v18 }
 0x29b   :  { %852 = vmatprep.subr.bf16.mxu1 %v1024_v13 }
 0x29e   :  { %853 = vmatpush3.bf16.msra.mxu1 %v598_v20 }
 0x29f   :  { %854 = vmatprep.subr.bf16.mxu1 %v1024_v13 }
 0x2a2   :  { %855 = vmatpush3.bf16.msra.mxu1 %v599_v21 }
 0x2a3   :  { %856 = vmatprep.subr.bf16.mxu1 %v1024_v13 }
 0x2a6   :  { %857 = vmatpush3.bf16.msra.mxu1 %v600_v22 }
 0x2a7   :  { %858 = vmatprep.subr.bf16.mxu1 %v1024_v13 }
 0x2aa   :  { %859 = vmatpush3.bf16.msra.mxu1 %v601_v23 }
 0x2ab   :  { %860 = vmatprep.subr.bf16.mxu1 %v1024_v13 }
 0x2ae   :  { %861 = vmatpush3.bf16.msra.mxu1 %v602_v24 }
 0x2af   :  { %862 = vmatprep.subr.bf16.mxu1 %v1024_v13 }
 0x2b2   :  { %863 = vmatpush3.bf16.msra.mxu1 %v603_v25 }
 0x2b5   :  { %865 = vmatmul.mubr.bf16.vlgmr.msra.gmra.mrb[16].mxu1 %v579_v26 }
 0x368   :  { %v833_v29 = vpop.f32.mrb[12].mxu1 }
 0x369   :  { %v834_v30 = vpop.f32.mrb[13].mxu1 }
 0x36a   :  { %v835_v31 = vadd.f32 %v834_v30, %v833_v29  ;;  %v836_v33 = vpop.f32.mrb[14].mxu1 }
 0x36b   :  { %v837_v34 = vpop.f32.mrb[15].mxu1 }
 0x36c   :  { %v838_v27 = vadd.f32 %v837_v34, %v836_v33  ;;  %v646_v37 = vadd.f32 %v835_v31, %v760_v35 }
 0x36e   :  { %v649_v41 = vadd.f32 %v838_v27, %v760_v35 }
 0x388   :  { %v686_v39 = vpop.f32.mrb[16].mxu1 }
 0x389   :  { %v687_v40 = vadd.f32 %v686_v39, %v646_v37  ;;  %v866_v32 = vpop.f32.mrb[17].mxu1 }
 0x38a   :  { %v689_v42 = vpop.f32.mrb[18].mxu1 }
 0x38b   :  { %906 = vtanh.f32 %v687_v40  ;;  %v690_v43 = vadd.f32 %v689_v42, %v649_v41  ;;  %v867_v44 = vpop.f32.mrb[19].mxu1 }
 0x38d   :  { %908 = vtanh.f32 %v690_v43 }
 0x395   :  { %v907_v45 = vpop.eup %906 }
 0x396   :  { %v702_v49 = vmul.f32 %v907_v45, %v761_v47 }
 0x397   :  { %v909_v48 = vpop.eup %908 }
 0x398   :  { %v703_v50 = vmul.f32 %v909_v48, %v761_v47 }
 0x39a   :  { %v771_v51 = vpack.c.bf16 %v703_v50, %v702_v49 }
 0x39c   :  { %772 = vst [vmem:[#allocation10] sm:$0xff] %v771_v51  }
 0x39d   :  { %987 = shalt.err (!%p984_p0)
}
 0x39e   :  { %s988_s23 = scalar_lea.hbm %s1214_s8, 128 }
 0x39f   :  { %p989_p1 = scmp.ne.s32.totalorder %s1214_s8, %s988_s23  ;;  %p992_p2 = scmp.lt.u32.totalorder %s988_s23, %s1214_s8 }
 0x3a1   :  { %p994_p3 = pnand %p992_p2, %p989_p1 }
 0x3a3   :  { %997 = shalt.err (!%p994_p3)
}
 0x3a4   :  { %725 = dma.vmem_to_hbm [thread:$0]  %s720_s20, 128, %s1214_s8, [#allocation7], %s1009_s15, %s1009_s15, %s1010_s16  }
 0x3a5   :  { %1006 = dma.done.wait [#allocation7], 128  }
 0x3a6   :  { %1007 = vsyncadd [#allocation7], 4294967168 }
 0x3a7   :  { %729 = vsyncpa [#allocation6], 1 }
 0x3a8   :  { %730 = vsyncpa [#allocation9], 1 }
 0x3a9   :  { %731 = vsyncpa [#allocation7], 1 }
 0x3aa   :  { %732 = vsyncmov [#allocation4] }
 0x3ad   :  { %s733_s29 = vpop.sfrf %732 }
 0x3ae   :  { %p764_p4 = scmp.ne.s32.totalorder %s733_s29, 0 }
 0x3b0   :  { %737 = shalt.err (%p764_p4)  }
 0x3b1   :  { %739 = vsyncmov [#allocation4 + $0x1] }
 0x3b4   :  { %s740_s0 = vpop.sfrf %739 }
 0x3b5   :  { %p765_p5 = scmp.ne.s32.totalorder %s740_s0, 0 }
 0x3b7   :  { %744 = shalt.err (%p765_p5)  }

</bundles_post_ra>
